<compile_context>
chip_gen: v7x
topology: tpu7x:2x2x1
jax: 0.10.0
libtpu: 0.0.40
codegen_flags: <defaults>
</compile_context>

<pallas_src>
import functools
import math

import jax
import jax.numpy as jnp
from jax import lax
from jax.experimental import pallas as pl
from jax.experimental.pallas import tpu as pltpu


def _flash_attn_kernel(xq_ref, xkv_ref, wq_ref, wkv_ref, bq_ref, bkv_ref,
                       o_ref, q_sc, m_sc, l_sc, acc_sc, *, d_out):
    # xq_ref : (TQ,  E) bf16      xkv_ref: (TKV, E) bf16
    # wq_ref : (E,   D) bf16      wkv_ref: (E, 2D)  bf16
    # bq_ref : (1,   D) f32       bkv_ref: (1, 2D)  f32
    # o_ref  : (TQ,  D)           scratch: q_sc (TQ,D) bf16, m/l (TQ,1) f32, acc (TQ,D) f32
    ki = pl.program_id(2)
    n_kv = pl.num_programs(2)

    @pl.when(ki == 0)
    def _init():
        # Q projection once per q-tile; 1/sqrt(E) already folded into wq/bq.
        q = jnp.dot(xq_ref[...], wq_ref[...],
                    preferred_element_type=jnp.float32) + bq_ref[...]
        q_sc[...] = q.astype(q_sc.dtype)
        m_sc[...] = jnp.full_like(m_sc, -jnp.inf)
        l_sc[...] = jnp.zeros_like(l_sc)
        acc_sc[...] = jnp.zeros_like(acc_sc)

    # Fused K/V projection for this kv tile (single MXU pass, N = 2D).
    kv = jnp.dot(xkv_ref[...], wkv_ref[...],
                 preferred_element_type=jnp.float32) + bkv_ref[...]
    k = kv[:, :d_out].astype(jnp.bfloat16)
    v = kv[:, d_out:].astype(jnp.bfloat16)

    # scores = q @ k^T without materializing a transpose (contract D of both).
    scores = lax.dot_general(
        q_sc[...], k,
        dimension_numbers=(((1,), (1,)), ((), ())),
        preferred_element_type=jnp.float32)

    # Online softmax update (f32).
    m_prev = m_sc[...]
    m_new = jnp.maximum(m_prev, jnp.max(scores, axis=-1, keepdims=True))
    alpha = jnp.exp(m_prev - m_new)
    p = jnp.exp(scores - m_new)
    l_sc[...] = alpha * l_sc[...] + jnp.sum(p, axis=-1, keepdims=True)
    acc_sc[...] = alpha * acc_sc[...] + jnp.dot(
        p.astype(jnp.bfloat16), v, preferred_element_type=jnp.float32)
    m_sc[...] = m_new

    @pl.when(ki == n_kv - 1)
    def _finalize():
        o_ref[...] = (acc_sc[...] *
                      pl.reciprocal(l_sc[...], approx=True)).astype(o_ref.dtype)


def _pick_tile(s):
    for t in (512, 256, 128):
        if s % t == 0:
            return t
    return s  # small / odd sequence lengths: one tile covering the full axis


def self_attention(x, wq, wk, wv, bq, bk, bv):
    """x: (B, S, E); w*: (E, D); b*: (D,) with D = E // 2. Returns (B, S, D)."""
    B, S, E = x.shape
    D = wq.shape[1]
    assert D == E // 2

    # Fold the 1/sqrt(E) attention scale into the Q projection; fuse K and V.
    scale = 1.0 / math.sqrt(E)
    wq_s = (wq * scale).astype(jnp.bfloat16)
    bq_s = (bq * scale).reshape(1, D).astype(jnp.float32)
    wkv = jnp.concatenate([wk, wv], axis=1).astype(jnp.bfloat16)      # (E, 2D)
    bkv = jnp.concatenate([bk, bv], axis=0).reshape(1, 2 * D).astype(jnp.float32)
    x_bf = x.astype(jnp.bfloat16)

    TQ = _pick_tile(S)
    TKV = _pick_tile(S)
    n_q = S // TQ
    n_kv = S // TKV

    kernel = functools.partial(_flash_attn_kernel, d_out=D)

    grid_spec = pltpu.PrefetchScalarGridSpec(
        num_scalar_prefetch=0,
        grid=(B, n_q, n_kv),
        in_specs=[
            # x, q-tile view
            pl.BlockSpec((None, TQ, E), lambda b, qi, ki: (b, qi, 0)),
            # x, kv-tile view
            pl.BlockSpec((None, TKV, E), lambda b, qi, ki: (b, ki, 0)),
            # weights / biases: constant index maps -> stay resident
            pl.BlockSpec((E, D), lambda b, qi, ki: (0, 0)),       # Wq (pre-scaled)
            pl.BlockSpec((E, 2 * D), lambda b, qi, ki: (0, 0)),   # Wkv fused
            pl.BlockSpec((1, D), lambda b, qi, ki: (0, 0)),       # bq (pre-scaled)
            pl.BlockSpec((1, 2 * D), lambda b, qi, ki: (0, 0)),   # bkv fused
        ],
        out_specs=pl.BlockSpec((None, TQ, D), lambda b, qi, ki: (b, qi, 0)),
        scratch_shapes=[
            pltpu.VMEM((TQ, D), jnp.bfloat16),   # q tile (computed once per q-tile)
            pltpu.VMEM((TQ, 1), jnp.float32),    # running max
            pltpu.VMEM((TQ, 1), jnp.float32),    # running denom
            pltpu.VMEM((TQ, D), jnp.float32),    # output accumulator
        ],
    )

    cost = pl.CostEstimate(
        flops=2 * B * S * E * 3 * D + 4 * B * S * S * D,
        transcendentals=B * S * S,
        bytes_accessed=(x_bf.size * 2 + (E * 3 * D + 3 * D) * 4 + B * S * D * 4),
    )

    return pl.pallas_call(
        kernel,
        out_shape=jax.ShapeDtypeStruct((B, S, D), x.dtype),
        grid_spec=grid_spec,
        compiler_params=pltpu.CompilerParams(
            dimension_semantics=("parallel", "parallel", "arbitrary")),
        cost_estimate=cost,
    )(x_bf, x_bf, wq_s, wkv, bq_s, bkv)


def self_attention_ref(x, wq, wk, wv, bq, bk, bv):
    """Pure-JAX f32 reference mirroring the PyTorch forward."""
    E = x.shape[-1]
    q = x @ wq + bq
    k = x @ wk + bk
    v = x @ wv + bv
    scores = jnp.einsum("bqd,bkd->bqk", q, k) / math.sqrt(E)
    p = jax.nn.softmax(scores, axis=2)
    return jnp.einsum("bqk,bkd->bqd", p, v)


if __name__ == "__main__":
    B, S, E = 2, 8, 32
    D = E // 2

    key = jax.random.PRNGKey(0)
    kx, kq, kk, kv, kbq, kbk, kbv = jax.random.split(key, 7)

    x = jax.random.normal(kx, (B, S, E), dtype=jnp.float32)

    # Deterministic init, same fan-in scaling spirit as nn.Linear (uniform +-1/sqrt(E)).
    bound = 1.0 / math.sqrt(E)
    # Stored already transposed relative to PyTorch: (in_features, out_features).
    wq = jax.random.uniform(kq, (E, D), jnp.float32, -bound, bound)
    wk = jax.random.uniform(kk, (E, D), jnp.float32, -bound, bound)
    wv = jax.random.uniform(kv, (E, D), jnp.float32, -bound, bound)
    bq = jax.random.uniform(kbq, (D,), jnp.float32, -bound, bound)
    bk = jax.random.uniform(kbk, (D,), jnp.float32, -bound, bound)
    bv = jax.random.uniform(kbv, (D,), jnp.float32, -bound, bound)

    out = self_attention(x, wq, wk, wv, bq, bk, bv)
    out = jax.block_until_ready(out)

    ref = self_attention_ref(x, wq, wk, wv, bq, bk, bv)
    assert out.shape == (B, S, D)
    # bf16 matmul inputs + approx reciprocal -> loosened tolerance vs f32 reference.
    max_err = float(jnp.max(jnp.abs(out - ref)))
    assert jnp.allclose(out, ref, atol=3e-2, rtol=3e-2), (
        f"mismatch vs reference (max abs err {max_err})")

    print("KERNEL_OK")
</pallas_src>

<mosaic_0001>
module attributes {stable_mosaic.version = 11 : i64} {
  func.func @_flash_attn_kernel(%arg0: i32, %arg1: i32, %arg2: i32, %arg3: memref<1x8x32xbf16, #tpu.memory_space<vmem>>, %arg4: memref<1x8x32xbf16, #tpu.memory_space<vmem>>, %arg5: memref<32x16xbf16, #tpu.memory_space<vmem>>, %arg6: memref<32x32xbf16, #tpu.memory_space<vmem>>, %arg7: memref<1x16xf32, #tpu.memory_space<vmem>>, %arg8: memref<1x32xf32, #tpu.memory_space<vmem>>, %arg9: memref<1x8x16xf32, #tpu.memory_space<vmem>>, %arg10: memref<8x16xbf16, #tpu.memory_space<vmem>>, %arg11: memref<8x1xf32, #tpu.memory_space<vmem>>, %arg12: memref<8x1xf32, #tpu.memory_space<vmem>>, %arg13: memref<8x16xf32, #tpu.memory_space<vmem>>) attributes {dimension_semantics = [#tpu.dimension_semantics<parallel>, #tpu.dimension_semantics<parallel>, #tpu.dimension_semantics<arbitrary>], iteration_bounds = array<i64: 2, 1, 1>, scalar_prefetch = 0 : i64, scratch_operands = 4 : i64, tpu.core_type = #tpu.core_type<tc>, window_params = [{transform_indices = @transform_0, window_bounds = array<i64: 1, 8, 32>}, {transform_indices = @transform_1, window_bounds = array<i64: 1, 8, 32>}, {pipeline_mode = #tpu.pipeline_mode<synchronous>, transform_indices = @transform_2, window_bounds = array<i64: 32, 16>}, {pipeline_mode = #tpu.pipeline_mode<synchronous>, transform_indices = @transform_3, window_bounds = array<i64: 32, 32>}, {pipeline_mode = #tpu.pipeline_mode<synchronous>, transform_indices = @transform_4, window_bounds = array<i64: 1, 16>}, {pipeline_mode = #tpu.pipeline_mode<synchronous>, transform_indices = @transform_5, window_bounds = array<i64: 1, 32>}, {transform_indices = @transform_6, window_bounds = array<i64: 1, 8, 16>}]} {
    %c0_i32 = arith.constant 0 : i32
    %0 = arith.cmpi eq, %arg2, %c0_i32 : i32
    %1 = arith.extui %0 : i1 to i32
    %c0_i32_0 = arith.constant 0 : i32
    %2 = arith.cmpi ne, %1, %c0_i32_0 : i32
    scf.if %2 {
      %c0_27 = arith.constant 0 : index
      %c0_28 = arith.constant 0 : index
      %c0_29 = arith.constant 0 : index
      %42 = vector.load %arg3[%c0_27, %c0_28, %c0_29] : memref<1x8x32xbf16, #tpu.memory_space<vmem>>, vector<1x8x32xbf16>
      %43 = vector.shape_cast %42 : vector<1x8x32xbf16> to vector<8x32xbf16>
      %c0_30 = arith.constant 0 : index
      %c0_31 = arith.constant 0 : index
      %44 = vector.load %arg5[%c0_30, %c0_31] : memref<32x16xbf16, #tpu.memory_space<vmem>>, vector<32x16xbf16>
      %cst_32 = arith.constant dense<0.000000e+00> : vector<8x16xf32>
      %45 = tpu.matmul %43, %44, %cst_32 {dimension_numbers = #tpu.dot_dimension_numbers<[1], [0], [0], [1], [0, 0, 1, 1], [], []>} : vector<8x32xbf16>, vector<32x16xbf16>, vector<8x16xf32> -> vector<8x16xf32>
      %c0_33 = arith.constant 0 : index
      %c0_34 = arith.constant 0 : index
      %46 = vector.load %arg7[%c0_33, %c0_34] : memref<1x16xf32, #tpu.memory_space<vmem>>, vector<1x16xf32>
      %47 = vector.broadcast %46 : vector<1x16xf32> to vector<8x16xf32>
      %48 = arith.addf %45, %47 : vector<8x16xf32>
      %49 = arith.truncf %48 : vector<8x16xf32> to vector<8x16xbf16>
      %c0_35 = arith.constant 0 : index
      %c0_36 = arith.constant 0 : index
      %50 = vector.load %arg10[%c0_35, %c0_36] : memref<8x16xbf16, #tpu.memory_space<vmem>>, vector<8x16xbf16>
      tpu.vector_store %arg10[%c0_35, %c0_36], %49 {strides = array<i32>} : memref<8x16xbf16, #tpu.memory_space<vmem>>, vector<8x16xbf16>,
      %cst_37 = arith.constant 0xFF800000 : f32
      %51 = vector.broadcast %cst_37 : f32 to vector<8x1xf32>
      %c0_38 = arith.constant 0 : index
      %c0_39 = arith.constant 0 : index
      %52 = vector.load %arg11[%c0_38, %c0_39] : memref<8x1xf32, #tpu.memory_space<vmem>>, vector<8x1xf32>
      tpu.vector_store %arg11[%c0_38, %c0_39], %51 {strides = array<i32>} : memref<8x1xf32, #tpu.memory_space<vmem>>, vector<8x1xf32>,
      %cst_40 = arith.constant 0.000000e+00 : f32
      %53 = vector.broadcast %cst_40 : f32 to vector<8x1xf32>
      %c0_41 = arith.constant 0 : index
      %c0_42 = arith.constant 0 : index
      %54 = vector.load %arg12[%c0_41, %c0_42] : memref<8x1xf32, #tpu.memory_space<vmem>>, vector<8x1xf32>
      tpu.vector_store %arg12[%c0_41, %c0_42], %53 {strides = array<i32>} : memref<8x1xf32, #tpu.memory_space<vmem>>, vector<8x1xf32>,
      %cst_43 = arith.constant 0.000000e+00 : f32
      %55 = vector.broadcast %cst_43 : f32 to vector<8x16xf32>
      %c0_44 = arith.constant 0 : index
      %c0_45 = arith.constant 0 : index
      %56 = vector.load %arg13[%c0_44, %c0_45] : memref<8x16xf32, #tpu.memory_space<vmem>>, vector<8x16xf32>
      tpu.vector_store %arg13[%c0_44, %c0_45], %55 {strides = array<i32>} : memref<8x16xf32, #tpu.memory_space<vmem>>, vector<8x16xf32>,
    } else {
    }
    %c0 = arith.constant 0 : index
    %c0_1 = arith.constant 0 : index
    %c0_2 = arith.constant 0 : index
    %3 = vector.load %arg4[%c0, %c0_1, %c0_2] : memref<1x8x32xbf16, #tpu.memory_space<vmem>>, vector<1x8x32xbf16>
    %4 = vector.shape_cast %3 : vector<1x8x32xbf16> to vector<8x32xbf16>
    %c0_3 = arith.constant 0 : index
    %c0_4 = arith.constant 0 : index
    %5 = vector.load %arg6[%c0_3, %c0_4] : memref<32x32xbf16, #tpu.memory_space<vmem>>, vector<32x32xbf16>
    %cst = arith.constant dense<0.000000e+00> : vector<8x32xf32>
    %6 = tpu.matmul %4, %5, %cst {dimension_numbers = #tpu.dot_dimension_numbers<[1], [0], [0], [1], [0, 0, 1, 1], [], []>} : vector<8x32xbf16>, vector<32x32xbf16>, vector<8x32xf32> -> vector<8x32xf32>
    %c0_5 = arith.constant 0 : index
    %c0_6 = arith.constant 0 : index
    %7 = vector.load %arg8[%c0_5, %c0_6] : memref<1x32xf32, #tpu.memory_space<vmem>>, vector<1x32xf32>
    %8 = vector.broadcast %7 : vector<1x32xf32> to vector<8x32xf32>
    %9 = arith.addf %6, %8 : vector<8x32xf32>
    %10 = vector.extract_strided_slice %9 {offsets = [0, 0], sizes = [8, 16], strides = [1, 1]} : vector<8x32xf32> to vector<8x16xf32>
    %11 = arith.truncf %10 : vector<8x16xf32> to vector<8x16xbf16>
    %12 = vector.extract_strided_slice %9 {offsets = [0, 16], sizes = [8, 16], strides = [1, 1]} : vector<8x32xf32> to vector<8x16xf32>
    %13 = arith.truncf %12 : vector<8x16xf32> to vector<8x16xbf16>
    %c0_7 = arith.constant 0 : index
    %c0_8 = arith.constant 0 : index
    %14 = vector.load %arg10[%c0_7, %c0_8] : memref<8x16xbf16, #tpu.memory_space<vmem>>, vector<8x16xbf16>
    %cst_9 = arith.constant dense<0.000000e+00> : vector<8x8xf32>
    %15 = tpu.matmul %14, %11, %cst_9 {dimension_numbers = #tpu.dot_dimension_numbers<[1], [1], [0], [0], [0, 0, 1, 0], [], []>} : vector<8x16xbf16>, vector<8x16xbf16>, vector<8x8xf32> -> vector<8x8xf32>
    %c0_10 = arith.constant 0 : index
    %c0_11 = arith.constant 0 : index
    %16 = vector.load %arg11[%c0_10, %c0_11] : memref<8x1xf32, #tpu.memory_space<vmem>>, vector<8x1xf32>
    %cst_12 = arith.constant dense<0xFF800000> : vector<8xf32>
    %17 = vector.multi_reduction <maximumf>, %15, %cst_12 [1] : vector<8x8xf32> to vector<8xf32>
    %18 = vector.shape_cast %17 : vector<8xf32> to vector<8x1xf32>
    %19 = arith.maximumf %16, %18 : vector<8x1xf32>
    %20 = arith.subf %16, %19 : vector<8x1xf32>
    %21 = math.exp %20 : vector<8x1xf32>
    %22 = vector.broadcast %19 : vector<8x1xf32> to vector<8x8xf32>
    %23 = arith.subf %15, %22 : vector<8x8xf32>
    %24 = math.exp %23 : vector<8x8xf32>
    %c0_13 = arith.constant 0 : index
    %c0_14 = arith.constant 0 : index
    %25 = vector.load %arg12[%c0_13, %c0_14] : memref<8x1xf32, #tpu.memory_space<vmem>>, vector<8x1xf32>
    %26 = arith.mulf %21, %25 : vector<8x1xf32>
    %cst_15 = arith.constant dense<0.000000e+00> : vector<8xf32>
    %27 = vector.multi_reduction <add>, %24, %cst_15 [1] : vector<8x8xf32> to vector<8xf32>
    %28 = vector.shape_cast %27 : vector<8xf32> to vector<8x1xf32>
    %29 = arith.addf %26, %28 : vector<8x1xf32>
    %c0_16 = arith.constant 0 : index
    %c0_17 = arith.constant 0 : index
    %30 = vector.load %arg12[%c0_16, %c0_17] : memref<8x1xf32, #tpu.memory_space<vmem>>, vector<8x1xf32>
    tpu.vector_store %arg12[%c0_16, %c0_17], %29 {strides = array<i32>} : memref<8x1xf32, #tpu.memory_space<vmem>>, vector<8x1xf32>,
    %c0_18 = arith.constant 0 : index
    %c0_19 = arith.constant 0 : index
    %31 = vector.load %arg13[%c0_18, %c0_19] : memref<8x16xf32, #tpu.memory_space<vmem>>, vector<8x16xf32>
    %32 = vector.broadcast %21 : vector<8x1xf32> to vector<8x16xf32>
    %33 = arith.mulf %32, %31 : vector<8x16xf32>
    %34 = arith.truncf %24 : vector<8x8xf32> to vector<8x8xbf16>
    %cst_20 = arith.constant dense<0.000000e+00> : vector<8x16xf32>
    %35 = tpu.matmul %34, %13, %cst_20 {dimension_numbers = #tpu.dot_dimension_numbers<[1], [0], [0], [1], [0, 0, 1, 1], [], []>} : vector<8x8xbf16>, vector<8x16xbf16>, vector<8x16xf32> -> vector<8x16xf32>
    %36 = arith.addf %33, %35 : vector<8x16xf32>
    %c0_21 = arith.constant 0 : index
    %c0_22 = arith.constant 0 : index
    %37 = vector.load %arg13[%c0_21, %c0_22] : memref<8x16xf32, #tpu.memory_space<vmem>>, vector<8x16xf32>
    tpu.vector_store %arg13[%c0_21, %c0_22], %36 {strides = array<i32>} : memref<8x16xf32, #tpu.memory_space<vmem>>, vector<8x16xf32>,
    %c0_23 = arith.constant 0 : index
    %c0_24 = arith.constant 0 : index
    %38 = vector.load %arg11[%c0_23, %c0_24] : memref<8x1xf32, #tpu.memory_space<vmem>>, vector<8x1xf32>
    tpu.vector_store %arg11[%c0_23, %c0_24], %19 {strides = array<i32>} : memref<8x1xf32, #tpu.memory_space<vmem>>, vector<8x1xf32>,
    %c0_i32_25 = arith.constant 0 : i32
    %39 = arith.cmpi eq, %arg2, %c0_i32_25 : i32
    %40 = arith.extui %39 : i1 to i32
    %c0_i32_26 = arith.constant 0 : i32
    %41 = arith.cmpi ne, %40, %c0_i32_26 : i32
    scf.if %41 {
      %c0_27 = arith.constant 0 : index
      %c0_28 = arith.constant 0 : index
      %42 = vector.load %arg13[%c0_27, %c0_28] : memref<8x16xf32, #tpu.memory_space<vmem>>, vector<8x16xf32>
      %c0_29 = arith.constant 0 : index
      %c0_30 = arith.constant 0 : index
      %43 = vector.load %arg12[%c0_29, %c0_30] : memref<8x1xf32, #tpu.memory_space<vmem>>, vector<8x1xf32>
      %44 = tpu.reciprocal %43 {approx = true} : vector<8x1xf32> -> vector<8x1xf32>
      %45 = vector.broadcast %44 : vector<8x1xf32> to vector<8x16xf32>
      %46 = arith.mulf %42, %45 : vector<8x16xf32>
      %c0_31 = arith.constant 0 : index
      %c0_32 = arith.constant 0 : index
      %c0_33 = arith.constant 0 : index
      %47 = vector.load %arg9[%c0_31, %c0_32, %c0_33] : memref<1x8x16xf32, #tpu.memory_space<vmem>>, vector<1x8x16xf32>
      %48 = vector.shape_cast %47 : vector<1x8x16xf32> to vector<8x16xf32>
      %49 = vector.shape_cast %46 : vector<8x16xf32> to vector<1x8x16xf32>
      tpu.vector_store %arg9[%c0_31, %c0_32, %c0_33], %49 {strides = array<i32>} : memref<1x8x16xf32, #tpu.memory_space<vmem>>, vector<1x8x16xf32>,
    } else {
    }
    return
  }
  func.func @transform_0(%arg0: i32, %arg1: i32, %arg2: i32) -> (i32, i32, i32) {
    %c0_i32 = arith.constant 0 : i32
    %c0_i32_0 = arith.constant 0 : i32
    return %arg0, %arg1, %c0_i32 : i32, i32, i32
  }
  func.func @transform_1(%arg0: i32, %arg1: i32, %arg2: i32) -> (i32, i32, i32) {
    %c0_i32 = arith.constant 0 : i32
    %c0_i32_0 = arith.constant 0 : i32
    return %arg0, %arg2, %c0_i32 : i32, i32, i32
  }
  func.func @transform_2(%arg0: i32, %arg1: i32, %arg2: i32) -> (i32, i32) {
    %c0_i32 = arith.constant 0 : i32
    %c0_i32_0 = arith.constant 0 : i32
    %c0_i32_1 = arith.constant 0 : i32
    return %c0_i32, %c0_i32_0 : i32, i32
  }
  func.func @transform_3(%arg0: i32, %arg1: i32, %arg2: i32) -> (i32, i32) {
    %c0_i32 = arith.constant 0 : i32
    %c0_i32_0 = arith.constant 0 : i32
    %c0_i32_1 = arith.constant 0 : i32
    return %c0_i32, %c0_i32_0 : i32, i32
  }
  func.func @transform_4(%arg0: i32, %arg1: i32, %arg2: i32) -> (i32, i32) {
    %c0_i32 = arith.constant 0 : i32
    %c0_i32_0 = arith.constant 0 : i32
    %c0_i32_1 = arith.constant 0 : i32
    return %c0_i32, %c0_i32_0 : i32, i32
  }
  func.func @transform_5(%arg0: i32, %arg1: i32, %arg2: i32) -> (i32, i32) {
    %c0_i32 = arith.constant 0 : i32
    %c0_i32_0 = arith.constant 0 : i32
    %c0_i32_1 = arith.constant 0 : i32
    return %c0_i32, %c0_i32_0 : i32, i32
  }
  func.func @transform_6(%arg0: i32, %arg1: i32, %arg2: i32) -> (i32, i32, i32) {
    %c0_i32 = arith.constant 0 : i32
    %c0_i32_0 = arith.constant 0 : i32
    return %arg0, %arg1, %c0_i32 : i32, i32, i32
  }
}

</mosaic_0001>

<bundles_post_ra>
// kernel: tpu_custom_call.1
= control target key start
LH: loop header
LB: loop body
LE: loop exit
PB: predicated region body
PF: predicated region fallthrough
CT: control target
= control target key end

     0   :  { %11 = vsyncpa [#allocation7], 0  ;;  %s1238_s0 = inlined_call_operand.vmem [shape: bf16[2,8,32], index: 0, kind: input, shape index: {}]   ;;  %s1239_s1 = inlined_call_operand.hbm [shape: bf16[2,8,32], index: 1, kind: input, shape index: {}]   ;;  %s1240_s2 = inlined_call_operand.vmem [shape: bf16[32,16], index: 2, kind: input, shape index: {}]   ;;  %s1241_s3 = inlined_call_operand.vmem [shape: bf16[32,32], index: 3, kind: input, shape index: {}]   ;;  %s1242_s4 = inlined_call_operand.vmem [shape: f32[1,16], index: 4, kind: input, shape index: {}]   ;;  %s1243_s5 = inlined_call_operand.vmem [shape: f32[1,32], index: 5, kind: input, shape index: {}]   ;;  %s1244_s6 = inlined_call_operand.hbm [shape: f32[2,8,16], index: 6, kind: output, shape index: {}]  }
   0x1   :  { %13 = vsyncpa [#allocation7 + $0x1], 0 }
   0x2   :  { %14 = vsyncpa [#allocation8], 0 }
   0x3   :  { %16 = vsyncpa [#allocation8 + $0x1], 0  ;;  %s1026_s21 = smov 0   ;;  %s1028_s22 = smov 0  }
   0x4   :  { %s1030_s23 = smov 0   ;;  %s1032_s24 = smov 0  }
   0x5   :  { %s1034_s25 = smov 0   ;;  %s1036_s26 = smov 0  }
   0x6 LB: > { %s729_s27 = sadd.s32 4294967295, %s982_s26   ;;  %s730_s28 = sadd.s32 4294967294, %s982_s26   ;;  %s982_s26 = sphi %s1036_s26, %s22_s26   ;;  %s978_s25 = sphi %s1034_s25, %s1260_s25   ;;  %s974_s24 = sphi %s1032_s24, %s1259_s24   ;;  %s970_s23 = sphi %s1030_s23, %s1258_s23   ;;  %s966_s22 = sphi %s1028_s22, %s1257_s22   ;;  %s962_s21 = sphi %s1026_s21, %s1256_s21  }
   0x7   : > { %s41_s29 = sadd.s32 1, %s978_s25  ;;  %s78_s30 = sadd.s32 1, %s970_s23 }
   0x8   : > { %p43_p0 = scmp.ge.s32.totalorder %s41_s29, 2  ;;  %p85_p1 = scmp.ne.s32.totalorder %s970_s23, %s966_s22 }
   0x9   : > { %p86_p2 = scmp.eq.s32.totalorder %s982_s26, 0  ;;  %p91_p3 = scmp.ne.s32.totalorder %s966_s22, %s962_s21 }
   0xa   : > { %s1262_s29 = smov (%p43_p0, %s41_s29), 0  ;;  %p92_p5 = scmp.eq.s32.totalorder %s729_s27, 0 }
   0xb   : > { %p1067_p4 = por %p86_p2, %p85_p1  ;;  %s73_s8 = ssub.s32 %s978_s25, %s1262_s29 }
   0xc   : > { %p201_p6 = scmp.eq.s32.totalorder %s729_s27, 1  ;;  %p76_p7 = scmp.eq.s32.totalorder %s73_s8, 0 }
   0xd   : > { %p1073_p8 = por %p92_p5, %p91_p3  ;;  %p207_p10 = scmp.eq.s32.totalorder %s730_s28, 1 }
   0xe   : > { %p1077_p9 = por %p201_p6, %p85_p1  ;;  %p803_p13 = scmp.lt.s32.totalorder %s982_s26, 2 }
   0xf   : > { %s1082_s11 = scalar_select %p76_p7, %s970_s23, %s78_s30  }
  0x10   : > { %s1248_s10 = scalar_select %p1077_p9, 1, 0 }
  0x11   : > { %p1084_p11 = por %p207_p10, %p91_p3  ;;  %s249_s13 = sand.u32 1, %s970_s23  }
  0x12   : > { %s733_s14 = sshll.u32 %s249_s13, 2  ;;  %s734_s15 = sshll.u32 %s978_s25, 6 }
  0x13   : > { %s1249_s12 = scalar_select %p1084_p11, 1, 0 }
  0x14   : > { %s1095_s18 = scalar_lea.hbm %s1239_s1, %s734_s15  ;;  %s253_s19 = scalar_lea.vmem [#allocation6], %s733_s14 }
  0x15   : > { %s261_s20 = sshll.u32 %s253_s19, 4  ;;  %p1101_p0 = pnand %p803_p13, %p1067_p4  ;;  %s1097_s20 = int_to_ptr.vmem [resolvable:$true] %s261_s20 }
  0x16   : > { %s250_s28 = scalar_lea.sflag [#allocation7], %s249_s13  ;;  %s870_s30 = scalar_lea.hbm %s1095_s18, 64 }
  0x17   : > { %p871_p3 = scmp.ne.s32.totalorder %s1095_s18, %s870_s30  ;;  %p872_p5 = pneg %p1101_p0 }
  0x18   : > { %s875_s7 = scalar_lea.hbm %s1239_s1, 128  ;;  %p876_p4 = scmp.lt.u32.totalorder %s1095_s18, %s1239_s1 }
  0x19   : > { %p873_p6 = pnand %p872_p5, %p871_p3  ;;  %p877_p10 = scmp.lt.u32.totalorder %s875_s7, %s870_s30 }
  0x1a   : > { %p879_p12 = scmp.lt.u32.totalorder %s870_s30, %s1095_s18 }
  0x1b   : > { %p874_p7 = pneg %p873_p6  ;;  %p878_p13 = por %p877_p10, %p876_p4 }
  0x1d   : > { %p880_p1 = por %p879_p12, %p878_p13 }
  0x1f   : > { %p881_p2 = pnand %p880_p1, %p874_p7 }
  0x21   : > { %884 = shalt.err (!%p881_p2)
}
  0x22   : > { %s885_s13 = scalar_lea.vmem %s1097_s20, 64  ;;  %s984_s17 = smov [#allocation6]  }
  0x23   : > { %p886_p3 = scmp.ne.s32.totalorder %s1097_s20, %s885_s13  ;;  %s890_s19 = sshll.u32 %s984_s17, 4  ;;  %s891_s19 = int_to_ptr.vmem [resolvable:$false] %s890_s19 }
  0x24   : > { %s892_s8 = scalar_lea.vmem %s891_s19, 128  ;;  %p893_p9 = scmp.lt.s32.totalorder %s1097_s20, %s891_s19 }
  0x25   : > { %p888_p6 = pnand %p886_p3, %p872_p5  ;;  %p894_p4 = scmp.lt.s32.totalorder %s892_s8, %s885_s13 }
  0x27   : > { %p889_p11 = pneg %p888_p6  ;;  %p895_p10 = por %p894_p4, %p893_p9 }
  0x29   : > { %p896_p12 = pnand %p895_p10, %p889_p11 }
  0x2b   : > { %899 = shalt.err (!%p896_p12)
}
  0x2c   : > { %798 = dma.hbm_to_vmem [thread:$0]  (!%p1101_p0), %s1095_s18, 64, %s1097_s20, %s250_s28  }
  0x2d   : > { %p1251_p1 = scmp.lt.s32.totalorder %s982_s26, 3  ;;  %p1252_p2 = scmp.ge.s32.totalorder %s982_s26, 1 }
  0x2f   : > { %p267_p5 = pnand %p1252_p2, %p1251_p1 }
  0x30   : > { %s1137_s30 = sand.u32 (!%p267_p5), 1, %s966_s22  }
  0x31   : > { %270 = sbr.rel (%p267_p5) target bundleno = 1099 (0x44b), region = 44  ;;  %s736_s14 = sshll.u32 (!%p267_p5), %s1137_s30, 2 }
  0x32   : > { %s273_s7 = scalar_lea.sflag (!%p267_p5), [#allocation7], %s1137_s30  ;;  %s276_s15 = scalar_lea.vmem (!%p267_p5), [#allocation6], %s736_s14 }
  0x38   : > { %953 = dma.done.wait (%p1073_p8), %s273_s7, 64  }
  0x39   : > { %955 = vsyncadd (%p1073_p8), %s273_s7, 4294967232  ;;  %p312_p9 = scmp.lt.s32.totalorder %s974_s24, 1  ;;  %v985_v0 = vmov 0.0   ;;  %vm986_vm0 = vmmov 0   ;;  %v860_v1 = vld [vmem:[%s1240_s2] sm:$0xff]   ;;  %v862_v3 = vld [vmem:[%s1240_s2 + $0x8] sm:$0xff]  }
  0x3a   : > { %763 = vmatprep.subr.bf16.mxu0 %v985_v0  ;;  %771 = vmatprep.subr.bf16.mxu1 %v985_v0  ;;  %v861_v2 = vld [vmem:[%s1241_s3] sm:$0xff]   ;;  %v863_v4 = vld [vmem:[%s1241_s3 + $0x8] sm:$0xff]   ;;  %vm348_vm1 = vcmask 261120   ;;  %vm398_vm2 = vcmask 130048   ;;  %vm393_vm3 = vcmask 125952   ;;  %vm395_vm4 = vcmask 7168  }
  0x3b   : > { %767 = vmatprep.mubr.msk.bf16.mxu0 %vm986_vm0, %v985_v0  ;;  %775 = vmatprep.mubr.msk.bf16.mxu1 %vm986_vm0, %v985_v0  ;;  %s313_s18 = scalar_select %p312_p9, %s974_s24, 1  ;;  %v400_v6 = vld [vmem:[%s276_s15] sm:$0xf]  ;;  %399 = vst.msk [vmem:[#allocation5] sm:$0xff] %vm398_vm2, %v985_v0  ;;  %v988_v23 = vmov -inf   ;;  %vm556_vm5 = vcmask 1043456  }
  0x3c   : > { %764 = vmatpush3.bf16.msra.mxu0 %v860_v1  ;;  %772 = vmatpush3.bf16.msra.mxu1 %v861_v2  ;;  %v739_v7 = vld [vmem:[%s1242_s4] ss:$0 sm:$0xff]  ;;  %s987_s15 = smov 112   ;;  %396 = vst.msk [vmem:[#allocation3] sm:$0xff] %vm395_vm4, %v988_v23  ;;  %397 = vst.msk [vmem:[#allocation4] sm:$0xff] %vm395_vm4, %v985_v0  ;;  %vm518_vm6 = vcmask 64512  }
  0x3d   : > { %s738_s28 = sshll.u32 %s313_s18, 2  ;;  %765 = vmatprep.subr.bf16.mxu0 %v985_v0  ;;  %773 = vmatprep.subr.bf16.mxu1 %v985_v0  ;;  %v743_v8 = vld [vmem:[%s1243_s5] ss:$0 sm:$0xff]  ;;  %v989_v31 = vmov 0   ;;  %s737_s9 = sshll.u32 %s1137_s30, 3 }
  0x3e   : > { %s318_s20 = scalar_lea.vmem %s1238_s0, %s738_s28  ;;  %858 = vset.pattern.permute.xlu0 %v989_v31  ;;  %859 = vset.pattern.permute.xlu1 %v989_v31  ;;  %s750_s13 = sshll.u32 %s974_s24, 7 }
  0x3f   : > { %v324_v5 = vld [vmem:[%s318_s20] sm:$0xf]  ;;  %s311_s17 = scalar_lea.vmem [#allocation9], %s737_s9  ;;  %s1188_s7 = scalar_lea.hbm %s1244_s6, %s750_s13 }
  0x40   : > { %766 = vmatpush3.bf16.msra.mxu0 %v862_v3  ;;  %774 = vmatpush3.bf16.msra.mxu1 %v863_v4  ;;  %s631_s19 = sshll.u32 %s311_s17, 4  ;;  %s617_s20 = scalar_lea.sflag [#allocation8], %s1137_s30  ;;  %s1190_s19 = int_to_ptr.vmem [resolvable:$true] %s631_s19 }
  0x41   : > { %779 = vmatprep.subr.bf16.mxu0 %v985_v0  ;;  %785 = vmatprep.subr.bf16.mxu1 %v985_v0  ;;  %s900_s18 = scalar_lea.vmem %s1190_s19, 128  ;;  %p1253_p11 = scmp.ne.s32.totalorder %s1248_s10, 0 }
  0x42   : > { %v542_v50 = vld [vmem:[#allocation5] sm:$0xff]  ;;  %p901_p8 = scmp.ne.s32.totalorder %s1190_s19, %s900_s18  ;;  %s990_s24 = smov [#allocation9]  }
  0x43   : > { %768 = vmatmul.mubr.msk.bf16.vlgmr.msra.gmra.mrb[0].mxu0 %vm348_vm1, %v324_v5  ;;  %776 = vmatmul.mubr.msk.bf16.vlgmr.msra.gmra.mrb[0].mxu1 %vm348_vm1, %v400_v6  ;;  %v517_v32 = vld [vmem:[#allocation3] sm:$0xff]  ;;  %v534_v44 = vld [vmem:[#allocation4] sm:$0xff]  ;;  %s904_s27 = sshll.u32 %s990_s24, 4  ;;  %s905_s27 = int_to_ptr.vmem [resolvable:$false] %s904_s27 }
  0x44   : > { %781 = vmatprep.mubr.msk.bf16.mxu0 %vm986_vm0, %v985_v0  ;;  %787 = vmatprep.mubr.msk.bf16.mxu1 %vm986_vm0, %v985_v0  ;;  %p902_p0 = pnand %p901_p8, %p1253_p11  ;;  %s906_s28 = scalar_lea.vmem %s905_s27, 256 }
  0x45   : > { %p907_p13 = scmp.lt.s32.totalorder %s1190_s19, %s905_s27  ;;  %p908_p3 = scmp.lt.s32.totalorder %s906_s28, %s900_s18 }
  0x46   : > { %p903_p7 = pneg %p902_p0 }
  0x47   : > { %p909_p6 = por %p908_p3, %p907_p13 }
  0x49   : > { %p910_p4 = pnand %p909_p6, %p903_p7 }
 0x116   : > { %v386_v9 = vpop.f32.mrb[0].mxu0  ;;  %v462_v11 = vpop.f32.mrb[0].mxu1 }
 0x117   : > { %v387_v10 = vadd.f32 %v739_v7, %v386_v9  ;;  %v769_v12 = vpop.f32.mrb[1].mxu0  ;;  %v463_v13 = vadd.f32 %v743_v8, %v462_v11  ;;  %v777_v14 = vpop.f32.mrb[1].mxu1 }
 0x118   : > { %v389_v15 = vpop.f32.mrb[2].mxu0  ;;  %v465_v17 = vpop.f32.mrb[2].mxu1 }
 0x119   : > { %v392_v16 = vpack.c.bf16 %v387_v10, %v387_v10  ;;  %v770_v18 = vpop.f32.mrb[3].mxu0  ;;  %v468_v19 = vpack.c.bf16 %v463_v13, %v463_v13  ;;  %v778_v20 = vpop.f32.mrb[3].mxu1 }
 0x11b   : > { %394 = vst.msk [vmem:[#allocation2] sm:$0xf] %vm393_vm3, %v392_v16  ;;  %v475_v21 = vsel %vm398_vm2, %v468_v19, 0  ;;  %551 = vrot.lane.b32.xlu1 %v468_v19, %s987_s15 }
 0x11c   : > { %780 = vmatpush3.bf16.xpose.msra.mxu0 %v475_v21 }
 0x122   : > { %v469_v22 = vld [vmem:[#allocation2] sm:$0xf] }
 0x123   : > { %782 = vmatmul.mubr.msk.bf16.vlgmr.msra.gmra.mrb[4].mxu0 %vm398_vm2, %v469_v22 }
 0x18d   : > { %v552_v24 = vpop.permute.xlu1 %551 }
 0x18e   : > { %v558_v25 = vsel %vm556_vm5, %v552_v24, 0 }
 0x18f   : > { %786 = vmatpush3.bf16.msra.mxu1 %v558_v25 }
 0x1f6   : > { %v511_v26 = vpop.f32.mrb[4].mxu0 }
 0x1f7   : > { %v783_v27 = vpop.f32.mrb[5].mxu0  ;;  %v519_v28 = vsel %vm518_vm6, %v511_v26, -inf }
 0x1f8   : > { %520 = vmax.xlane.f32.xlu0 %v519_v28  ;;  %v514_v29 = vpop.f32.mrb[6].mxu0 }
 0x1f9   : > { %v784_v30 = vpop.f32.mrb[7].mxu0 }
 0x285   : > { %v521_v33 = vpop.xlane.xlu0 %520 }
 0x286   : > { %v522_v34 = vmax.f32 %v517_v32, %v521_v33 }
 0x288   : > { %v523_v35 = vsub.f32 %v517_v32, %v522_v34  ;;  %602 = vst.msk [vmem:[#allocation3] sm:$0xff] %vm395_vm4, %v522_v34  ;;  %528 = vperm.xlu0 %858, %v522_v34  }
 0x28a   : > { %v524_v42 = vmul.f32 1.442695, %v523_v35 }
 0x307   : > { %v529_v36 = vpop.permute.xlu0 %528 }
 0x308   : > { %v531_v37 = vsub.f32 %v511_v26, %v529_v36 }
 0x30a   : > { %v532_v38 = vmul.f32 1.442695, %v531_v37 }
 0x30c   : > { %864 = vpow2.f32 %v532_v38 }
 0x30d   : > { %866 = vpow2.f32 %v524_v42 }
 0x316   : > { %v865_v39 = vpop.eup %864 }
 0x317   : > { %v536_v40 = vsel %vm518_vm6, %v865_v39, 0.0  ;;  %v549_v41 = vpack.c.bf16 %v865_v39, %v865_v39  ;;  %v867_v43 = vpop.eup %866 }
 0x318   : > { %537 = vadd.xlane.f32.xlu1 %v536_v40  ;;  %v535_v45 = vmul.f32 %v867_v43, %v534_v44 }
 0x319   : > { %788 = vmatmul.mubr.msk.bf16.vlgmr.msra.gmra.mrb[4].mxu1 %vm518_vm6, %v549_v41 }
 0x329   : > { %545 = vperm.xlu1 %859, %v867_v43  }
 0x3a5   : > { %v538_v46 = vpop.xlane.xlu1 %537 }
 0x3a6   : > { %v539_v47 = vadd.f32 %v538_v46, %v535_v45 }
 0x3a8   : > { %541 = vst.msk [vmem:[#allocation4] sm:$0xff] %vm395_vm4, %v539_v47 }
 0x3a9   : > { %v546_v51 = vpop.permute.xlu1 %545 }
 0x3aa   : > { %v548_v52 = vmul.f32 %v546_v51, %v542_v50 }
 0x3af   : > { %v607_v48 = vld [vmem:[#allocation4] sm:$0xff] }
 0x3b0   : > { %868 = vrcp.f32 %v607_v48 }
 0x3ba   : > { %v869_v49 = vpop.eup %868 }
 0x3bb   : > { %611 = vperm.xlu0 %858, %v869_v49  }
 0x3ec   : > { %v594_v53 = vpop.f32.mrb[4].mxu1 }
 0x3ed   : > { %v600_v54 = vadd.f32 %v594_v53, %v548_v52  ;;  %v789_v55 = vpop.f32.mrb[5].mxu1 }
 0x3ee   : > { %v597_v56 = vpop.f32.mrb[6].mxu1 }
 0x3ef   : > { %601 = vst.msk [vmem:[#allocation5] sm:$0xff] %vm398_vm2, %v600_v54  ;;  %v790_v57 = vpop.f32.mrb[7].mxu1 }
 0x3f6   : > { %v606_v58 = vld [vmem:[#allocation5] sm:$0xff] }
 0x43a   : > { %v612_v59 = vpop.permute.xlu0 %611 }
 0x43b   : > { %v614_v60 = vmul.f32 %v612_v59, %v606_v58 }
 0x43d   : > { %615 = vst.msk [vmem:[%s311_s17] sm:$0xff] %vm398_vm2, %v614_v60 }
 0x43e   : > { %913 = shalt.err (!%p910_p4)
}
 0x43f   : > { %s914_s30 = scalar_lea.hbm %s1188_s7, 128  ;;  %s918_s9 = scalar_lea.hbm %s1244_s6, 256 }
 0x440   : > { %p915_p10 = scmp.ne.s32.totalorder %s1188_s7, %s914_s30  ;;  %p919_p2 = scmp.lt.u32.totalorder %s1188_s7, %s1244_s6 }
 0x441   : > { %p920_p5 = scmp.lt.u32.totalorder %s918_s9, %s914_s30  ;;  %p922_p8 = scmp.lt.u32.totalorder %s914_s30, %s1188_s7 }
 0x442   : > { %p916_p12 = pnand %p915_p10, %p1253_p11 }
 0x443   : > { %p921_p9 = por %p920_p5, %p919_p2 }
 0x444   : > { %p917_p1 = pneg %p916_p12 }
 0x445   : > { %p923_p0 = por %p922_p8, %p921_p9 }
 0x447   : > { %p924_p7 = pnand %p923_p0, %p917_p1 }
 0x449   : > { %927 = shalt.err (!%p924_p7)
}
 0x44a   : > { %793 = dma.vmem_to_hbm [thread:$0]  (%p1253_p11), %s1190_s19, 128, %s1188_s7, %s617_s20  }
 0x44b PF: > { %s643_s8 = sand.u32 1, %s962_s21   ;;  %p1254_p13 = scmp.ne.s32.totalorder %s1249_s12, 0 }
 0x44c   : > { %p1255_p3 = scmp.ge.s32.totalorder %s982_s26, 2  ;;  %s644_s14 = scalar_lea.sflag [#allocation8], %s643_s8 }
 0x44e   : > { %p800_p6 = pnand %p1255_p3, %p1254_p13 }
 0x450   : > { %957 = dma.done.wait (!%p800_p6), %s644_s14, 128  }
 0x451   : > { %959 = vsyncadd (!%p800_p6), %s644_s14, 4294967168  ;;  %s22_s26 = sadd.s32 1, %s982_s26   ;;  %s1256_s21 = smov %s966_s22 }
 0x452   : > { %p19_p4 = scmp.ge.s32.totalorder %s22_s26, 4   ;;  %s1257_s22 = smov %s970_s23 }
 0x453   : > { %s1258_s23 = smov %s1082_s11  ;;  %s1259_s24 = smov %s978_s25 }
 0x454   : > { %s1260_s25 = smov %s1262_s29  ;;  %21 = sbr.rel (!%p19_p4) target bundleno = 6 (0x6), region = 100 }
 0x45b   :  { %649 = vsyncpa [#allocation7], 1 }
 0x45c   :  { %651 = vsyncpa [#allocation7 + $0x1], 1 }
 0x45d   :  { %652 = vsyncpa [#allocation8], 1 }
 0x45e   :  { %654 = vsyncpa [#allocation8 + $0x1], 1 }

</bundles_post_ra>
